<compile_context>
chip_gen: v7x
topology: tpu7x:2x2x1
jax: 0.10.0
libtpu: 0.0.40
codegen_flags: <defaults>
</compile_context>

<pallas_src>
import jax
import jax.numpy as jnp
from jax.experimental import pallas as pl
from jax.experimental.pallas import tpu as pltpu


def _round_up(v, m):
    return ((v + m - 1) // m) * m


def _gat_gate_kernel(x_ref, adj_ref, wT_ref, wb_ref, w2_ref, b2_ref,
                     gwx_ref, gwh_ref, gb_ref, out_ref):
    Bt, N, F = x_ref.shape
    md = wT_ref.dtype                       # MXU operand dtype (bf16 default)

    x = x_ref[...]                          # (Bt, N, F) f32
    x2d = x.reshape(Bt * N, F).astype(md)   # one cast, reused by both matmuls

    # Two independent (Bt*N,F)x(F,F) MXU passes (A+A^T folded into W2/b2
    # host-side removes the serial h -> h @ Asym dependency), f32 accumulation.
    h2d = jnp.dot(x2d, wT_ref[...], preferred_element_type=jnp.float32) + wb_ref[...]
    mm2d = jnp.dot(x2d, w2_ref[...], preferred_element_type=jnp.float32) + b2_ref[...]

    h = h2d.reshape(Bt, N, F)
    h_md = h.astype(md)                     # hoisted cast, reused by both einsums
    mm_md = mm2d.reshape(Bt, N, F).astype(md)

    # e[b,j,k] = sum_l mm[b,j,l] h[b,k,l]  ( == e + e^T of the reference,
    # because mm already carries A + A^T ).
    e = jnp.einsum('bjl,bkl->bjk', mm_md, h_md,
                   preferred_element_type=jnp.float32)        # (Bt, N, N) f32

    adj = adj_ref[...]                      # (Bt, N, N) bf16 (or f32)
    att = jnp.where(adj > 0, e, -9000000000000000.0)
    m = jnp.max(att, axis=1, keepdims=True)       # softmax over dim=1 (torch)
    p = jnp.exp(att - m)
    denom = jnp.sum(p, axis=1, keepdims=True)
    att = p * pl.reciprocal(denom, approx=True)   # EUP vrcp (otherwise idle)
    att = att * adj.astype(jnp.float32)

    # h' = relu(attention @ h)
    h_prime = jnp.einsum('bij,bjf->bif', att.astype(md), h_md,
                         preferred_element_type=jnp.float32)
    h_prime = jnp.maximum(h_prime, 0.0)           # (Bt, N, F)

    # gate: sigmoid(<[x, h'], gate_w> + gate_b) as VPU mul + lane reduce
    g = (jnp.sum(x * gwx_ref[...], axis=-1, keepdims=True)
         + jnp.sum(h_prime * gwh_ref[...], axis=-1, keepdims=True)
         + gb_ref[0])                             # (Bt, N, 1)
    coeff = jax.nn.sigmoid(g)

    out = coeff * x + (1.0 - coeff) * h_prime     # (Bt, N, F)
    # Lane-dense store: the last dim N*F is a multiple of 128 for typical F,
    # so the store / output DMA is contiguous instead of 32/128-lane masked.
    out_ref[...] = out.reshape(Bt, 1, N * F)


def _chip_info():
    """Returns (vmem_capacity_bytes, dual_tensorcore) with safe fallbacks."""
    kind = ""
    try:
        kind = jax.devices()[0].device_kind.lower()
    except Exception:
        pass
    vmem = None
    try:
        vmem = int(getattr(pltpu.get_tpu_info(), "vmem_capacity_bytes", 0)) or None
    except Exception:
        vmem = None
    dual_tc = ("v7" in kind) or (vmem is not None and vmem <= 64 * 1024 * 1024)
    if vmem is None:
        if not kind:                      # unknown chip: stay conservative
            return 64 * 1024 * 1024, True
        vmem = 64 * 1024 * 1024 if dual_tc else 128 * 1024 * 1024
    return vmem, dual_tc


def _step_vmem_bytes(bt, N, F, adj_bytes, md_bytes):
    """Per-grid-step VMEM footprint estimate using (8,128)-padded tiles."""
    Np = _round_up(N, 8)
    Fp = _round_up(F, 128)
    NNp = _round_up(N, 128)
    NFp = _round_up(N * F, 128)
    b = 0
    b += 4 * bt * 2 * Np * Fp               # x block, double-buffered
    b += 4 * bt * 2 * 8 * NFp               # out block (Bt,1,N*F), double-buffered
    b += adj_bytes * bt * 2 * Np * NNp      # adj block, double-buffered
    b += 4 * bt * 3 * Np * Fp               # h / mm / h' f32 temporaries
    b += md_bytes * bt * 2 * Np * Fp        # h_md / mm_md casts
    b += 4 * bt * 3 * Np * NNp              # e / p / att f32 temporaries
    b += md_bytes * bt * Np * NNp           # att cast
    return b


def _pick_block_b(B, N, F, budget_bytes, dual_tc, adj_bytes, md_bytes):
    """Largest batch block Bt that fits the per-step VMEM budget.  On dual-TC
    chips (v7x) keep the grid >= 2 so both TensorCores get work and stop
    growing once Bt*N fills the 256-row MXU M dimension; on single-TC chips
    (v5e/v6e) just grow Bt to amortize the ~0.35 us/step pipeline overhead."""
    best = 1
    for bt in range(1, B + 1):
        if B % bt:
            continue
        if dual_tc and B >= 2 and B // bt < 2:
            continue
        if _step_vmem_bytes(bt, N, F, adj_bytes, md_bytes) > budget_bytes:
            continue
        best = bt
        if dual_tc and bt * N >= 256:
            break
    return best


def gat_gate_pallas(x, adj, w, wb, A, gw, gb, *,
                    matmul_dtype=jnp.bfloat16, adj_dtype=jnp.bfloat16,
                    block_b=None):
    """x: (B,N,F), adj: (B,N,N), w: (F_out,F_in), wb: (F_out,),
       A: (F_out,F_out), gw: (1, 2*F_out), gb: (1,).
       matmul_dtype controls the MXU operand dtype (bf16 default; accumulation
       and all elementwise math stay f32 — validate at ~1e-2; pass jnp.float32
       for ~1e-3 accuracy).  adj_dtype=bf16 is exact for binary adjacencies;
       pass jnp.float32 for arbitrary-valued adjacency weights."""
    B, N, F = x.shape
    assert adj.shape == (B, N, N)
    assert w.shape[0] == w.shape[1] == F, "n_in_feature must equal n_out_feature"

    x = jnp.asarray(x, jnp.float32)
    adj_c = jnp.asarray(adj, adj_dtype)
    w = jnp.asarray(w, jnp.float32)
    A = jnp.asarray(A, jnp.float32)

    # Host-side folds (all in f32, cast to the MXU dtype last).
    A_sym = A + A.T                                   # folds e + e^T
    wT_f32 = w.T                                      # (F_in, F_out)
    wb_f32 = jnp.asarray(wb, jnp.float32).reshape(1, F)
    W2_f32 = wT_f32 @ A_sym                           # x@W2 == (x@W^T)@Asym
    b2_f32 = wb_f32 @ A_sym
    wT = wT_f32.astype(matmul_dtype)
    W2 = W2_f32.astype(matmul_dtype)

    gw_flat = jnp.asarray(gw, jnp.float32).reshape(2 * F)
    gwx = gw_flat[:F].reshape(1, F)                   # gate weight (x part)
    gwh = gw_flat[F:].reshape(1, F)                   # gate weight (h' part)
    gb1 = jnp.asarray(gb, jnp.float32).reshape(1)     # SMEM scalar

    adj_bytes = jnp.dtype(adj_dtype).itemsize
    md_bytes = jnp.dtype(matmul_dtype).itemsize

    vmem_cap, dual_tc = _chip_info()
    if dual_tc:                                       # v7x: 64 MiB VMEM, 2 TCs
        block_budget = min(24 * 1024 * 1024, vmem_cap // 3)
        clamp = min(48 * 1024 * 1024, int(0.75 * vmem_cap))
    else:                                             # v5e/v6e: 128 MiB, 1 TC
        block_budget = min(56 * 1024 * 1024, vmem_cap // 2)
        clamp = min(96 * 1024 * 1024, int(0.75 * vmem_cap))

    Bt = block_b if block_b is not None else _pick_block_b(
        B, N, F, block_budget, dual_tc, adj_bytes, md_bytes)
    assert B % Bt == 0, "block_b must divide the batch size"
    grid = (B // Bt,)

    weight_bytes = 2 * md_bytes * _round_up(F, 8) * _round_up(F, 128) \
        + 4 * 4 * 8 * _round_up(F, 128)
    est = _step_vmem_bytes(Bt, N, F, adj_bytes, md_bytes) + weight_bytes
    vmem_limit = int(min(clamp, max(32 * 1024 * 1024, 2 * est)))

    grid_spec = pltpu.PrefetchScalarGridSpec(
        num_scalar_prefetch=0,
        grid=grid,
        in_specs=[
            pl.BlockSpec((Bt, N, F), lambda b: (b, 0, 0)),       # x
            pl.BlockSpec((Bt, N, N), lambda b: (b, 0, 0)),       # adj (compressed)
            pl.BlockSpec((F, F), lambda b: (0, 0)),              # W^T
            pl.BlockSpec((1, F), lambda b: (0, 0)),              # W bias
            pl.BlockSpec((F, F), lambda b: (0, 0)),              # W2 = W^T (A+A^T)
            pl.BlockSpec((1, F), lambda b: (0, 0)),              # b2 = wb (A+A^T)
            pl.BlockSpec((1, F), lambda b: (0, 0)),              # gate w (x)
            pl.BlockSpec((1, F), lambda b: (0, 0)),              # gate w (h')
            pl.BlockSpec(memory_space=pltpu.MemorySpace.SMEM),   # gate bias
        ],
        out_specs=pl.BlockSpec((Bt, 1, N * F), lambda b: (b, 0, 0)),
    )

    out_flat = pl.pallas_call(
        _gat_gate_kernel,
        out_shape=jax.ShapeDtypeStruct((B, 1, N * F), jnp.float32),
        grid_spec=grid_spec,
        compiler_params=pltpu.CompilerParams(
            dimension_semantics=("parallel",),
            vmem_limit_bytes=vmem_limit),
    )(x, adj_c, wT, wb_f32, W2, b2_f32, gwx, gwh, gb1)

    # Free reshape (identical row-major byte layout).
    return out_flat.reshape(B, N, F)


def gat_gate_reference(x, adj, w, wb, A, gw, gb):
    """Pure-JAX reference mirroring the PyTorch forward."""
    h = jnp.einsum('bnf,of->bno', x, w) + wb
    mm = jnp.matmul(h, A)
    e = jnp.einsum('ijl,ikl->ijk', mm, h)
    e = e + jnp.transpose(e, (0, 2, 1))
    att = jnp.where(adj > 0, e, -9000000000000000.0 * jnp.ones_like(e))
    att = jax.nn.softmax(att, axis=1)
    att = att * adj
    h_prime = jax.nn.relu(jnp.einsum('aij,ajk->aik', att, h))
    cat = jnp.concatenate([x, h_prime], axis=-1)
    coeff = jax.nn.sigmoid(jnp.einsum('bnf,of->bno', cat, gw) + gb)   # (B,N,1)
    return coeff * x + (1.0 - coeff) * h_prime


if __name__ == "__main__":
    B, N, F = 2, 16, 32     # n_in_feature = n_out_feature = 32

    key = jax.random.PRNGKey(0)
    kx, kadj, kw, kwb, kA, kgw, kgb = jax.random.split(key, 7)

    x = jax.random.normal(kx, (B, N, F), dtype=jnp.float32)

    # symmetric binary adjacency with self-loops
    raw = jax.random.uniform(kadj, (B, N, N))
    adj = (raw > 0.6).astype(jnp.float32)
    adj = jnp.maximum(adj, jnp.transpose(adj, (0, 2, 1)))
    adj = jnp.maximum(adj, jnp.eye(N, dtype=jnp.float32)[None, :, :])

    # deterministic parameters (shapes from the module __init__)
    w = 0.1 * jax.random.normal(kw, (F, F), dtype=jnp.float32)        # W.weight (out, in)
    wb = 0.1 * jax.random.normal(kwb, (F,), dtype=jnp.float32)        # W.bias
    A = 0.1 * jax.random.normal(kA, (F, F), dtype=jnp.float32)        # A (random for a non-trivial test)
    gw = 0.1 * jax.random.normal(kgw, (1, 2 * F), dtype=jnp.float32)  # gate.weight
    gb = 0.1 * jax.random.normal(kgb, (1,), dtype=jnp.float32)        # gate.bias

    ref = jax.block_until_ready(gat_gate_reference(x, adj, w, wb, A, gw, gb))

    # Exact mode (f32 MXU operands, f32 adj): tight check.
    out_f32 = jax.block_until_ready(
        gat_gate_pallas(x, adj, w, wb, A, gw, gb,
                        matmul_dtype=jnp.float32, adj_dtype=jnp.float32))
    assert out_f32.shape == (B, N, F)
    assert jnp.allclose(out_f32, ref, rtol=2e-3, atol=2e-3), "f32 mode mismatch"

    # Default fast mode (bf16 MXU operands, bf16 adj, f32 accumulation).
    out = jax.block_until_ready(gat_gate_pallas(x, adj, w, wb, A, gw, gb))
    assert out.shape == (B, N, F)
    assert jnp.allclose(out, ref, rtol=2e-2, atol=2e-2), "bf16 mode mismatch"

    print("KERNEL_OK")
</pallas_src>

<mosaic_0001>
module attributes {stable_mosaic.version = 11 : i64} {
  func.func @_gat_gate_kernel(%arg0: i32, %arg1: memref<2x16x32xf32, #tpu.memory_space<vmem>>, %arg2: memref<2x16x16xf32, #tpu.memory_space<vmem>>, %arg3: memref<32x32xf32, #tpu.memory_space<vmem>>, %arg4: memref<1x32xf32, #tpu.memory_space<vmem>>, %arg5: memref<32x32xf32, #tpu.memory_space<vmem>>, %arg6: memref<1x32xf32, #tpu.memory_space<vmem>>, %arg7: memref<1x32xf32, #tpu.memory_space<vmem>>, %arg8: memref<1x32xf32, #tpu.memory_space<vmem>>, %arg9: memref<1xf32, #tpu.memory_space<smem>>, %arg10: memref<2x1x512xf32, #tpu.memory_space<vmem>>) attributes {dimension_semantics = [#tpu.dimension_semantics<parallel>], iteration_bounds = array<i64: 1>, scalar_prefetch = 0 : i64, scratch_operands = 0 : i64, tpu.core_type = #tpu.core_type<tc>, window_params = [{transform_indices = @transform_0, window_bounds = array<i64: 2, 16, 32>}, {transform_indices = @transform_1, window_bounds = array<i64: 2, 16, 16>}, {pipeline_mode = #tpu.pipeline_mode<synchronous>, transform_indices = @transform_2, window_bounds = array<i64: 32, 32>}, {pipeline_mode = #tpu.pipeline_mode<synchronous>, transform_indices = @transform_3, window_bounds = array<i64: 1, 32>}, {pipeline_mode = #tpu.pipeline_mode<synchronous>, transform_indices = @transform_4, window_bounds = array<i64: 32, 32>}, {pipeline_mode = #tpu.pipeline_mode<synchronous>, transform_indices = @transform_5, window_bounds = array<i64: 1, 32>}, {pipeline_mode = #tpu.pipeline_mode<synchronous>, transform_indices = @transform_6, window_bounds = array<i64: 1, 32>}, {pipeline_mode = #tpu.pipeline_mode<synchronous>, transform_indices = @transform_7, window_bounds = array<i64: 1, 32>}, {transform_indices = @transform_8, window_bounds = array<i64: 1>}, {transform_indices = @transform_9, window_bounds = array<i64: 2, 1, 512>}]} {
    %c0 = arith.constant 0 : index
    %c0_0 = arith.constant 0 : index
    %c0_1 = arith.constant 0 : index
    %0 = vector.load %arg1[%c0, %c0_0, %c0_1] : memref<2x16x32xf32, #tpu.memory_space<vmem>>, vector<2x16x32xf32>
    %1 = vector.shape_cast %0 : vector<2x16x32xf32> to vector<32x32xf32>
    %c0_2 = arith.constant 0 : index
    %c0_3 = arith.constant 0 : index
    %2 = vector.load %arg3[%c0_2, %c0_3] : memref<32x32xf32, #tpu.memory_space<vmem>>, vector<32x32xf32>
    %cst = arith.constant dense<0.000000e+00> : vector<32x32xf32>
    %3 = tpu.matmul %1, %2, %cst {dimension_numbers = #tpu.dot_dimension_numbers<[1], [0], [0], [1], [0, 0, 1, 1], [], []>} : vector<32x32xf32>, vector<32x32xf32>, vector<32x32xf32> -> vector<32x32xf32>
    %c0_4 = arith.constant 0 : index
    %c0_5 = arith.constant 0 : index
    %4 = vector.load %arg4[%c0_4, %c0_5] : memref<1x32xf32, #tpu.memory_space<vmem>>, vector<1x32xf32>
    %5 = vector.broadcast %4 : vector<1x32xf32> to vector<32x32xf32>
    %6 = arith.addf %3, %5 : vector<32x32xf32>
    %c0_6 = arith.constant 0 : index
    %c0_7 = arith.constant 0 : index
    %7 = vector.load %arg5[%c0_6, %c0_7] : memref<32x32xf32, #tpu.memory_space<vmem>>, vector<32x32xf32>
    %cst_8 = arith.constant dense<0.000000e+00> : vector<32x32xf32>
    %8 = tpu.matmul %1, %7, %cst_8 {dimension_numbers = #tpu.dot_dimension_numbers<[1], [0], [0], [1], [0, 0, 1, 1], [], []>} : vector<32x32xf32>, vector<32x32xf32>, vector<32x32xf32> -> vector<32x32xf32>
    %c0_9 = arith.constant 0 : index
    %c0_10 = arith.constant 0 : index
    %9 = vector.load %arg6[%c0_9, %c0_10] : memref<1x32xf32, #tpu.memory_space<vmem>>, vector<1x32xf32>
    %10 = vector.broadcast %9 : vector<1x32xf32> to vector<32x32xf32>
    %11 = arith.addf %8, %10 : vector<32x32xf32>
    %12 = vector.shape_cast %6 : vector<32x32xf32> to vector<2x16x32xf32>
    %13 = vector.shape_cast %11 : vector<32x32xf32> to vector<2x16x32xf32>
    "tpu.trace_start"() <{level = 10 : i32, message = "bjl,bkl->bjk"}> : () -> ()
    %cst_11 = arith.constant dense<0.000000e+00> : vector<2x16x16xf32>
    %14 = tpu.matmul %13, %12, %cst_11 {dimension_numbers = #tpu.dot_dimension_numbers<[2], [2], [1], [1], [0, 0, 0, 1, 1, 1], [0], [0]>} : vector<2x16x32xf32>, vector<2x16x32xf32>, vector<2x16x16xf32> -> vector<2x16x16xf32>
    "tpu.trace_stop"() : () -> ()
    %c0_12 = arith.constant 0 : index
    %c0_13 = arith.constant 0 : index
    %c0_14 = arith.constant 0 : index
    %15 = vector.load %arg2[%c0_12, %c0_13, %c0_14] : memref<2x16x16xf32, #tpu.memory_space<vmem>>, vector<2x16x16xf32>
    %cst_15 = arith.constant 0.000000e+00 : f32
    %16 = vector.broadcast %cst_15 : f32 to vector<2x16x16xf32>
    %17 = arith.cmpf ogt, %15, %16 : vector<2x16x16xf32>
    %cst_16 = arith.constant -9.000000e+15 : f32
    %18 = vector.broadcast %cst_16 : f32 to vector<2x16x16xf32>
    %19 = arith.select %17, %14, %18 : vector<2x16x16xi1>, vector<2x16x16xf32>
    %cst_17 = arith.constant dense<0xFF800000> : vector<2x16xf32>
    %20 = vector.multi_reduction <maximumf>, %19, %cst_17 [1] : vector<2x16x16xf32> to vector<2x16xf32>
    %21 = vector.shape_cast %20 : vector<2x16xf32> to vector<2x1x16xf32>
    %22 = vector.broadcast %21 : vector<2x1x16xf32> to vector<2x16x16xf32>
    %23 = arith.subf %19, %22 : vector<2x16x16xf32>
    %24 = math.exp %23 : vector<2x16x16xf32>
    %cst_18 = arith.constant dense<0.000000e+00> : vector<2x16xf32>
    %25 = vector.multi_reduction <add>, %24, %cst_18 [1] : vector<2x16x16xf32> to vector<2x16xf32>
    %26 = vector.shape_cast %25 : vector<2x16xf32> to vector<2x1x16xf32>
    %27 = tpu.reciprocal %26 {approx = true} : vector<2x1x16xf32> -> vector<2x1x16xf32>
    %28 = vector.broadcast %27 : vector<2x1x16xf32> to vector<2x16x16xf32>
    %29 = arith.mulf %24, %28 : vector<2x16x16xf32>
    %30 = arith.mulf %29, %15 : vector<2x16x16xf32>
    "tpu.trace_start"() <{level = 10 : i32, message = "bij,bjf->bif"}> : () -> ()
    %cst_19 = arith.constant dense<0.000000e+00> : vector<2x16x32xf32>
    %31 = tpu.matmul %30, %12, %cst_19 {dimension_numbers = #tpu.dot_dimension_numbers<[2], [1], [1], [2], [0, 0, 0, 1, 1, 2], [0], [0]>} : vector<2x16x16xf32>, vector<2x16x32xf32>, vector<2x16x32xf32> -> vector<2x16x32xf32>
    "tpu.trace_stop"() : () -> ()
    %cst_20 = arith.constant 0.000000e+00 : f32
    %32 = vector.broadcast %cst_20 : f32 to vector<2x16x32xf32>
    %33 = arith.maximumf %31, %32 : vector<2x16x32xf32>
    %c0_21 = arith.constant 0 : index
    %c0_22 = arith.constant 0 : index
    %34 = vector.load %arg7[%c0_21, %c0_22] : memref<1x32xf32, #tpu.memory_space<vmem>>, vector<1x32xf32>
    %35 = vector.shape_cast %34 : vector<1x32xf32> to vector<1x1x32xf32>
    %36 = vector.broadcast %35 : vector<1x1x32xf32> to vector<2x16x32xf32>
    %37 = arith.mulf %0, %36 : vector<2x16x32xf32>
    %cst_23 = arith.constant dense<0.000000e+00> : vector<2x16xf32>
    %38 = vector.multi_reduction <add>, %37, %cst_23 [2] : vector<2x16x32xf32> to vector<2x16xf32>
    %39 = vector.shape_cast %38 : vector<2x16xf32> to vector<2x16x1xf32>
    %c0_24 = arith.constant 0 : index
    %c0_25 = arith.constant 0 : index
    %40 = vector.load %arg8[%c0_24, %c0_25] : memref<1x32xf32, #tpu.memory_space<vmem>>, vector<1x32xf32>
    %41 = vector.shape_cast %40 : vector<1x32xf32> to vector<1x1x32xf32>
    %42 = vector.broadcast %41 : vector<1x1x32xf32> to vector<2x16x32xf32>
    %43 = arith.mulf %33, %42 : vector<2x16x32xf32>
    %cst_26 = arith.constant dense<0.000000e+00> : vector<2x16xf32>
    %44 = vector.multi_reduction <add>, %43, %cst_26 [2] : vector<2x16x32xf32> to vector<2x16xf32>
    %45 = vector.shape_cast %44 : vector<2x16xf32> to vector<2x16x1xf32>
    %46 = arith.addf %39, %45 : vector<2x16x1xf32>
    %c0_27 = arith.constant 0 : index
    %47 = memref.load %arg9[%c0_27] : memref<1xf32, #tpu.memory_space<smem>>
    %48 = vector.broadcast %47 : f32 to vector<2x16x1xf32>
    %49 = arith.addf %46, %48 : vector<2x16x1xf32>
    %50 = arith.negf %49 : vector<2x16x1xf32>
    %51 = math.exp %50 : vector<2x16x1xf32>
    %cst_28 = arith.constant 1.000000e+00 : f32
    %52 = vector.broadcast %cst_28 : f32 to vector<2x16x1xf32>
    %53 = arith.addf %52, %51 : vector<2x16x1xf32>
    %54 = arith.divf %52, %53 : vector<2x16x1xf32>
    %55 = vector.broadcast %54 : vector<2x16x1xf32> to vector<2x16x32xf32>
    %56 = arith.mulf %55, %0 : vector<2x16x32xf32>
    %cst_29 = arith.constant 1.000000e+00 : f32
    %57 = vector.broadcast %cst_29 : f32 to vector<2x16x1xf32>
    %58 = arith.subf %57, %54 : vector<2x16x1xf32>
    %59 = vector.broadcast %58 : vector<2x16x1xf32> to vector<2x16x32xf32>
    %60 = arith.mulf %59, %33 : vector<2x16x32xf32>
    %61 = arith.addf %56, %60 : vector<2x16x32xf32>
    %62 = vector.shape_cast %61 : vector<2x16x32xf32> to vector<2x1x512xf32>
    %c0_30 = arith.constant 0 : index
    %c0_31 = arith.constant 0 : index
    %c0_32 = arith.constant 0 : index
    %63 = vector.load %arg10[%c0_30, %c0_31, %c0_32] : memref<2x1x512xf32, #tpu.memory_space<vmem>>, vector<2x1x512xf32>
    tpu.vector_store %arg10[%c0_30, %c0_31, %c0_32], %62 {strides = array<i32>} : memref<2x1x512xf32, #tpu.memory_space<vmem>>, vector<2x1x512xf32>,
    return
  }
  func.func @transform_0(%arg0: i32) -> (i32, i32, i32) {
    %c0_i32 = arith.constant 0 : i32
    %c0_i32_0 = arith.constant 0 : i32
    %c0_i32_1 = arith.constant 0 : i32
    return %arg0, %c0_i32, %c0_i32_0 : i32, i32, i32
  }
  func.func @transform_1(%arg0: i32) -> (i32, i32, i32) {
    %c0_i32 = arith.constant 0 : i32
    %c0_i32_0 = arith.constant 0 : i32
    %c0_i32_1 = arith.constant 0 : i32
    return %arg0, %c0_i32, %c0_i32_0 : i32, i32, i32
  }
  func.func @transform_2(%arg0: i32) -> (i32, i32) {
    %c0_i32 = arith.constant 0 : i32
    %c0_i32_0 = arith.constant 0 : i32
    %c0_i32_1 = arith.constant 0 : i32
    return %c0_i32, %c0_i32_0 : i32, i32
  }
  func.func @transform_3(%arg0: i32) -> (i32, i32) {
    %c0_i32 = arith.constant 0 : i32
    %c0_i32_0 = arith.constant 0 : i32
    %c0_i32_1 = arith.constant 0 : i32
    return %c0_i32, %c0_i32_0 : i32, i32
  }
  func.func @transform_4(%arg0: i32) -> (i32, i32) {
    %c0_i32 = arith.constant 0 : i32
    %c0_i32_0 = arith.constant 0 : i32
    %c0_i32_1 = arith.constant 0 : i32
    return %c0_i32, %c0_i32_0 : i32, i32
  }
  func.func @transform_5(%arg0: i32) -> (i32, i32) {
    %c0_i32 = arith.constant 0 : i32
    %c0_i32_0 = arith.constant 0 : i32
    %c0_i32_1 = arith.constant 0 : i32
    return %c0_i32, %c0_i32_0 : i32, i32
  }
  func.func @transform_6(%arg0: i32) -> (i32, i32) {
    %c0_i32 = arith.constant 0 : i32
    %c0_i32_0 = arith.constant 0 : i32
    %c0_i32_1 = arith.constant 0 : i32
    return %c0_i32, %c0_i32_0 : i32, i32
  }
  func.func @transform_7(%arg0: i32) -> (i32, i32) {
    %c0_i32 = arith.constant 0 : i32
    %c0_i32_0 = arith.constant 0 : i32
    %c0_i32_1 = arith.constant 0 : i32
    return %c0_i32, %c0_i32_0 : i32, i32
  }
  func.func @transform_8(%arg0: i32) -> i32 {
    %c0_i32 = arith.constant 0 : i32
    %c0_i32_0 = arith.constant 0 : i32
    return %c0_i32 : i32
  }
  func.func @transform_9(%arg0: i32) -> (i32, i32, i32) {
    %c0_i32 = arith.constant 0 : i32
    %c0_i32_0 = arith.constant 0 : i32
    %c0_i32_1 = arith.constant 0 : i32
    return %arg0, %c0_i32, %c0_i32_0 : i32, i32, i32
  }
}

</mosaic_0001>

<bundles_post_ra>
// kernel: tpu_custom_call.1
= control target key start
LH: loop header
LB: loop body
LE: loop exit
PB: predicated region body
PF: predicated region fallthrough
CT: control target
= control target key end

     0   :  { %15 = vsyncpa [#allocation4], 0  ;;  %s1950_s0 = inlined_call_operand.hbm [shape: f32[2,16,32], index: 0, kind: input, shape index: {}]   ;;  %s1951_s1 = inlined_call_operand.hbm [shape: f32[2,16,16], index: 1, kind: input, shape index: {}]   ;;  %s1952_s2 = inlined_call_operand.hbm [shape: f32[32,32], index: 2, kind: input, shape index: {}]   ;;  %s1953_s3 = inlined_call_operand.vmem [shape: f32[1,32], index: 3, kind: input, shape index: {}]   ;;  %s1954_s4 = inlined_call_operand.hbm [shape: f32[32,32], index: 4, kind: input, shape index: {}]   ;;  %s1955_s5 = inlined_call_operand.vmem [shape: f32[1,32], index: 5, kind: input, shape index: {}]   ;;  %s1956_s6 = inlined_call_operand.vmem [shape: f32[1,32], index: 6, kind: input, shape index: {}]   ;;  %s1957_s7 = inlined_call_operand.vmem [shape: f32[1,32], index: 7, kind: input, shape index: {}]   ;;  %s1958_s8 = inlined_call_operand.<no memory space> [shape: f32[1], index: 8, kind: input, shape index: {}]   ;;  %s1959_s9 = inlined_call_operand.hbm [shape: f32[2,1,512], index: 9, kind: output, shape index: {}]  }
   0x1   :  { %16 = vsyncpa [#allocation7], 0 }
   0x2   :  { %17 = vsyncpa [#allocation10], 0 }
   0x3   :  { %18 = vsyncpa [#allocation5], 0  ;;  %s1519_s30 = smov [#allocation6]   ;;  %s1520_s11 = smov [#allocation3]  }
   0x4   :  { %s36_s10 = sshll.u32 %s1519_s30, 4  ;;  %s24_s12 = sshll.u32 %s1520_s11, 4  ;;  %s37_s10 = int_to_ptr.vmem [resolvable:$true] %s36_s10  ;;  %s1584_s12 = int_to_ptr.vmem [resolvable:$true] %s24_s12 }
   0x5   :  { %s1401_s15 = scalar_lea.hbm %s1951_s1, 512 }
   0x6   :  { %p1402_p0 = scmp.ne.s32.totalorder %s1951_s1, %s1401_s15  ;;  %p1405_p1 = scmp.lt.u32.totalorder %s1401_s15, %s1951_s1 }
   0x8   :  { %p1407_p2 = pnand %p1405_p1, %p1402_p0 }
   0xa   :  { %1410 = shalt.err (!%p1407_p2)
}
   0xb   :  { %s1411_s20 = scalar_lea.vmem %s37_s10, 512  ;;  %p1416_p4 = scmp.lt.s32.totalorder %s37_s10, %s37_s10 }
   0xc   :  { %p1412_p3 = scmp.ne.s32.totalorder %s37_s10, %s1411_s20  ;;  %p1417_p5 = scmp.lt.s32.totalorder %s1411_s20, %s1411_s20 }
   0xe   :  { %p1418_p6 = por %p1417_p5, %p1416_p4 }
  0x10   :  { %p1419_p7 = pnand %p1418_p6, %p1412_p3 }
  0x12   :  { %1422 = shalt.err (!%p1419_p7)
}
  0x13   :  { %s1521_s21 = smov 128   ;;  %s1522_s22 = smov 8  }
  0x14   :  { %42 = dma.hbm_to_vmem [thread:$0]  %s1951_s1, 512, %s37_s10, [#allocation7], %s1521_s21, %s1521_s21, %s1522_s22  }
  0x15   :  { %s1423_s27 = scalar_lea.hbm %s1950_s0, 512 }
  0x16   :  { %p1424_p8 = scmp.ne.s32.totalorder %s1950_s0, %s1423_s27  ;;  %p1427_p9 = scmp.lt.u32.totalorder %s1423_s27, %s1950_s0 }
  0x18   :  { %p1429_p10 = pnand %p1427_p9, %p1424_p8 }
  0x1a   :  { %1432 = shalt.err (!%p1429_p10)
}
  0x1b   :  { %s1433_s13 = scalar_lea.vmem %s1584_s12, 512  ;;  %p1438_p12 = scmp.lt.s32.totalorder %s1584_s12, %s1584_s12 }
  0x1c   :  { %p1434_p11 = scmp.ne.s32.totalorder %s1584_s12, %s1433_s13  ;;  %p1439_p13 = scmp.lt.s32.totalorder %s1433_s13, %s1433_s13 }
  0x1e   :  { %p1440_p0 = por %p1439_p13, %p1438_p12 }
  0x20   :  { %p1441_p1 = pnand %p1440_p0, %p1434_p11 }
  0x22   :  { %1444 = shalt.err (!%p1441_p1)
}
  0x23   :  { %30 = dma.hbm_to_vmem [thread:$0]  %s1950_s0, 512, %s1584_s12, [#allocation4], %s1521_s21, %s1521_s21, %s1522_s22  }
  0x24   :  { %s1523_s14 = smov [#allocation8]   ;;  %s1524_s16 = smov [#allocation9]  }
  0x25   :  { %s48_s15 = sshll.u32 %s1523_s14, 4  ;;  %s62_s17 = sshll.u32 %s1524_s16, 4  ;;  %s49_s15 = int_to_ptr.vmem [resolvable:$true] %s48_s15  ;;  %s1621_s17 = int_to_ptr.vmem [resolvable:$true] %s62_s17 }
  0x26   :  { %s1445_s20 = scalar_lea.hbm %s1952_s2, 512 }
  0x27   :  { %p1446_p2 = scmp.ne.s32.totalorder %s1952_s2, %s1445_s20  ;;  %p1449_p3 = scmp.lt.u32.totalorder %s1445_s20, %s1952_s2 }
  0x29   :  { %p1451_p4 = pnand %p1449_p3, %p1446_p2 }
  0x2b   :  { %1454 = shalt.err (!%p1451_p4)
}
  0x2c   :  { %s1455_s0 = scalar_lea.vmem %s49_s15, 512  ;;  %p1460_p6 = scmp.lt.s32.totalorder %s49_s15, %s49_s15 }
  0x2d   :  { %p1456_p5 = scmp.ne.s32.totalorder %s49_s15, %s1455_s0  ;;  %p1461_p7 = scmp.lt.s32.totalorder %s1455_s0, %s1455_s0 }
  0x2f   :  { %p1462_p8 = por %p1461_p7, %p1460_p6 }
  0x31   :  { %p1463_p9 = pnand %p1462_p8, %p1456_p5 }
  0x33   :  { %1466 = shalt.err (!%p1463_p9)
}
  0x34   :  { %54 = dma.hbm_to_vmem [thread:$0]  %s1952_s2, 512, %s49_s15, [#allocation7], %s1521_s21, %s1521_s21, %s1522_s22  }
  0x35   :  { %s1467_s30 = scalar_lea.hbm %s1954_s4, 512 }
  0x36   :  { %p1468_p10 = scmp.ne.s32.totalorder %s1954_s4, %s1467_s30  ;;  %p1471_p11 = scmp.lt.u32.totalorder %s1467_s30, %s1954_s4 }
  0x38   :  { %p1473_p12 = pnand %p1471_p11, %p1468_p10 }
  0x3a   :  { %1476 = shalt.err (!%p1473_p12)
}
  0x3b   :  { %s1477_s14 = scalar_lea.vmem %s1621_s17, 512  ;;  %p1482_p0 = scmp.lt.s32.totalorder %s1621_s17, %s1621_s17 }
  0x3c   :  { %p1478_p13 = scmp.ne.s32.totalorder %s1621_s17, %s1477_s14  ;;  %p1483_p1 = scmp.lt.s32.totalorder %s1477_s14, %s1477_s14 }
  0x3e   :  { %p1484_p2 = por %p1483_p1, %p1482_p0 }
  0x40   :  { %p1485_p3 = pnand %p1484_p2, %p1478_p13 }
  0x42   :  { %1488 = shalt.err (!%p1485_p3)
}
  0x43   :  { %68 = dma.hbm_to_vmem [thread:$0]  %s1954_s4, 512, %s1621_s17, [#allocation10], %s1521_s21, %s1521_s21, %s1522_s22  }
  0x44   :  { %1511 = dma.done.wait [#allocation4], 512  }
  0x45   :  { %1512 = vsyncadd [#allocation4], 4294966784 }
  0x46   :  { %1513 = dma.done.wait [#allocation7], 1024  }
  0x47   :  { %1514 = vsyncadd [#allocation7], 4294966272 }
  0x48   :  { %1515 = dma.done.wait [#allocation10], 512  }
  0x49   :  { %1516 = vsyncadd [#allocation10], 4294966784  ;;  %vm104_vm0 = vcmask 261120   ;;  %v93_v0 = vld [vmem:[#allocation8] sm:$0xff]  ;;  %v94_v1 = vld [vmem:[#allocation8 + $0x8] sm:$0xff]  ;;  %vm484_vm3 = vcmask 130048  }
  0x4a   :  { %v95_v2 = vld [vmem:[#allocation8 + $0x10] sm:$0xff]  ;;  %v1322_v3 = vpack.c.bf16 %v94_v1, %v93_v0  ;;  %v96_v4 = vld [vmem:[#allocation8 + $0x18] sm:$0xff]  ;;  %v1658_v5 = vld [vmem:[#allocation3] sm:$0xff]  ;;  %s1529_s19 = smov 64   ;;  %s1530_s20 = smov 96   ;;  %vm1099_vm7 = vcmask 523264  }
  0x4b   :  { %v1326_v6 = vpack.c.bf16 %v96_v4, %v95_v2  ;;  %1274 = vmatprep.mubr.msk.f32.mxu0 %vm104_vm0, %v1658_v5  ;;  %v202_v7 = vld [vmem:[#allocation9] sm:$0xff]  ;;  %v203_v8 = vld [vmem:[#allocation9 + $0x8] sm:$0xff]  ;;  %1288 = vmatprep.mubr.msk.f32.mxu1 %vm104_vm0, %v1658_v5  ;;  %v204_v10 = vld [vmem:[#allocation9 + $0x10] sm:$0xff]  ;;  %vm1102_vm8 = vcmask 785408   ;;  %s1532_s23 = smov [#allocation11]  }
  0x4c   :  { %1323 = vmatprep.subr.bf16.mxu0 %v1322_v3  ;;  %v1330_v9 = vpack.c.bf16 %v203_v8, %v202_v7  ;;  %v205_v11 = vld [vmem:[#allocation9 + $0x18] sm:$0xff]  ;;  %v1664_v13 = vld [vmem:[#allocation3 + $0x8] sm:$0xff]  ;;  %v1666_v14 = vld [vmem:[#allocation3 + $0x10] sm:$0xff]  ;;  %s1192_s24 = sshll.u32 %s1532_s23, 4  ;;  %s1193_s24 = int_to_ptr.vmem [resolvable:$true] %s1192_s24 }
  0x4d   :  { %1325 = vmatpush3.bf16.msra.mxu0 %v1322_v3  ;;  %v1334_v12 = vpack.c.bf16 %v205_v11, %v204_v10  ;;  %v1672_v15 = vld [vmem:[#allocation3 + $0x18] sm:$0xff]  ;;  %v1206_v16 = vld [vmem:[%s1953_s3] ss:$0 sm:$0xff]  ;;  %vm1690_vm1 = vmpackc.low %vm104_vm0, %vm104_vm0  ;;  %s1489_s25 = scalar_lea.vmem %s1193_s24, 128  ;;  %p1494_p5 = scmp.lt.s32.totalorder %s1193_s24, %s1193_s24 }
  0x4e   :  { %1327 = vmatprep.subr.bf16.mxu0 %v1326_v6  ;;  %1331 = vmatprep.subr.bf16.mxu1 %v1330_v9  ;;  %v1211_v20 = vld [vmem:[%s1955_s5] ss:$0 sm:$0xff]  ;;  %v1717_v42 = vld [vmem:[#allocation6 + $0x8] sm:$0xff]  ;;  %v1723_v44 = vld [vmem:[#allocation6 + $0x18] sm:$0xff]  ;;  %p1490_p4 = scmp.ne.s32.totalorder %s1193_s24, %s1489_s25  ;;  %p1495_p6 = scmp.lt.s32.totalorder %s1489_s25, %s1489_s25 }
  0x4f   :  { %1333 = vmatpush3.bf16.msra.mxu1 %v1330_v9  ;;  %v1709_v37 = vld [vmem:[%s1956_s6] ss:$0 sm:$0xff]  ;;  %vm477_vm2 = vcmp.gt.f32.partialorder %v1717_v42, 0.0  ;;  %v1725_v46 = vld [vmem:[#allocation6 + $0x10] sm:$0xff]  ;;  %vm479_vm5 = vcmp.gt.f32.partialorder %v1723_v44, 0.0 }
  0x50   :  { %1335 = vmatprep.subr.bf16.mxu1 %v1334_v12  ;;  %v718_v38 = vmul.f32 %v1709_v37, %v1666_v14  ;;  %v716_v39 = vmul.f32 %v1709_v37, %v1658_v5  ;;  %v1719_v43 = vld [vmem:[#allocation6] sm:$0xff]  ;;  %vm478_vm6 = vcmp.gt.f32.partialorder %v1725_v46, 0.0  ;;  %p1496_p7 = por %p1495_p6, %p1494_p5 }
  0x51   :  { %1329 = vmatpush3.bf16.msra.mxu0 %v1326_v6  ;;  %vm476_vm4 = vcmp.gt.f32.partialorder %v1719_v43, 0.0 }
  0x52   :  { %v726_v40 = vsel %vm104_vm0, %v718_v38, 0.0  ;;  %v720_v41 = vsel %vm104_vm0, %v716_v39, 0.0  ;;  %p1497_p8 = pnand %p1496_p7, %p1490_p4 }
  0x53   :  { %1337 = vmatpush3.bf16.msra.mxu1 %v1334_v12  ;;  %727 = vadd.xlane.f32.xlu1 %v726_v40 }
  0x54   :  { %1275 = vmatmul.mubr.msk.f32.vlgmr.msra.gmra.mrb[0].mxu0 %vm104_vm0, %v1664_v13  ;;  %721 = vadd.xlane.f32.xlu0 %v720_v41 }
  0x55   :  { %1277 = vmatprep.mubr.msk.f32.mxu0 %vm104_vm0, %v1666_v14 }
  0x56   :  { %1289 = vmatmul.mubr.msk.f32.vlgmr.msra.gmra.mrb[0].mxu1 %vm104_vm0, %v1664_v13 }
  0x57   :  { %1291 = vmatprep.mubr.msk.f32.mxu1 %vm104_vm0, %v1666_v14 }
  0x58   :  { %1278 = vmatmul.mubr.msk.f32.gmra.mrb[2].mxu0 %vm104_vm0, %v1672_v15 }
  0x5a   :  { %1292 = vmatmul.mubr.msk.f32.gmra.mrb[2].mxu1 %vm104_vm0, %v1672_v15 }
 0x127   :  { %v1276_v17 = vpop.f32.mrb[0].mxu0 }
 0x128   :  { %v189_v18 = vadd.f32 %v1276_v17, %v1206_v16  ;;  %v183_v19 = vpop.f32.mrb[1].mxu0 }
 0x129   :  { %v184_v21 = vadd.f32 %v1206_v16, %v183_v19  ;;  %v1290_v22 = vpop.f32.mrb[0].mxu1 }
 0x12a   :  { %v279_v24 = vpop.f32.mrb[1].mxu1  ;;  %v285_v35 = vadd.f32 %v1290_v22, %v1211_v20 }
 0x12b   :  { %v1338_v25 = vpack.c.bf16 %v189_v18, %v184_v21  ;;  %v1279_v26 = vpop.f32.mrb[2].mxu0  ;;  %v280_v27 = vadd.f32 %v1211_v20, %v279_v24 }
 0x12c   :  { %v199_v28 = vadd.f32 %v1279_v26, %v1206_v16  ;;  %v193_v29 = vpop.f32.mrb[3].mxu0 }
 0x12d   :  { %v194_v30 = vadd.f32 %v1206_v16, %v193_v29  ;;  %1340 = vmatprep.subr.msk.bf16.mxu0 %vm1690_vm1, %v1338_v25  ;;  %v1293_v31 = vpop.f32.mrb[2].mxu1  ;;  %1298 = vmatprep.mubr.msk.f32.mxu0 %vm104_vm0, %v280_v27 }
 0x12e   :  { %1343 = vmatpush3.bf16.xpose.msk.msra.mxu0 %vm1690_vm1, %v1338_v25  ;;  %v289_v32 = vpop.f32.mrb[3].mxu1  ;;  %v295_v36 = vadd.f32 %v1293_v31, %v1211_v20 }
 0x12f   :  { %v1344_v33 = vpack.c.bf16 %v199_v28, %v194_v30  ;;  %1351 = vmatprep.subr.bf16.mxu0 %v1338_v25  ;;  %v290_v34 = vadd.f32 %v1211_v20, %v289_v32 }
 0x131   :  { %1346 = vmatprep.subr.msk.bf16.mxu1 %vm1690_vm1, %v1344_v33  ;;  %1305 = vmatprep.mubr.msk.f32.mxu1 %vm104_vm0, %v290_v34 }
 0x132   :  { %1349 = vmatpush3.bf16.xpose.msk.msra.mxu1 %vm1690_vm1, %v1344_v33 }
 0x133   :  { %1355 = vmatprep.subr.bf16.mxu1 %v1344_v33 }
 0x135   :  { %1299 = vmatmul.mubr.msk.f32.vlgmr.msra.gmra.mrb[4].mxu0 %vm104_vm0, %v285_v35 }
 0x136   :  { %1353 = vmatpush3.bf16.msra.mxu0 %v1338_v25 }
 0x139   :  { %1306 = vmatmul.mubr.msk.f32.vlgmr.msra.gmra.mrb[4].mxu1 %vm104_vm0, %v295_v36 }
 0x13a   :  { %1357 = vmatpush3.bf16.msra.mxu1 %v1344_v33 }
 0x208   :  { %v1300_v45 = vpop.f32.mrb[4].mxu0 }
 0x209   :  { %v481_v47 = vsel %vm477_vm2, %v1300_v45, -9e+15  ;;  %v376_v48 = vpop.f32.mrb[5].mxu0 }
 0x20a   :  { %v486_v49 = vsel %vm484_vm3, %v481_v47, -inf  ;;  %v480_v50 = vsel %vm476_vm4, %v376_v48, -9e+15 }
 0x20b   :  { %v485_v51 = vsel %vm484_vm3, %v480_v50, -inf }
 0x20c   :  { %v487_v52 = vmax.f32 %v485_v51, %v486_v49  ;;  %v1307_v53 = vpop.f32.mrb[4].mxu1 }
 0x20d   :  { %v483_v54 = vsel %vm479_vm5, %v1307_v53, -9e+15  ;;  %v463_v55 = vpop.f32.mrb[5].mxu1 }
 0x20e   :  { %v488_v56 = vrot.slane %v487_v52, 4  ;;  %v495_v57 = vsel %vm484_vm3, %v483_v54, -inf  ;;  %v482_v58 = vsel %vm478_vm6, %v463_v55, -9e+15 }
 0x20f   :  { %v494_v59 = vsel %vm484_vm3, %v482_v58, -inf }
 0x210   :  { %v489_v60 = vmax.f32 %v487_v52, %v488_v56  ;;  %v496_v61 = vmax.f32 %v494_v59, %v495_v57 }
 0x212   :  { %v490_v62 = vrot.slane %v489_v60, 2  ;;  %v497_v63 = vrot.slane %v496_v61, 4 }
 0x214   :  { %v491_v0 = vmax.f32 %v489_v60, %v490_v62  ;;  %v498_v1 = vmax.f32 %v496_v61, %v497_v63 }
 0x216   :  { %v492_v2 = vrot.slane %v491_v0, 1  ;;  %v499_v3 = vrot.slane %v498_v1, 2 }
 0x218   :  { %v493_v4 = vmax.f32 %v491_v0, %v492_v2  ;;  %v500_v6 = vmax.f32 %v498_v1, %v499_v3 }
 0x21a   :  { %v503_v7 = vsub.f32 %v480_v50, %v493_v4  ;;  %v504_v8 = vsub.f32 %v481_v47, %v493_v4  ;;  %v501_v9 = vrot.slane %v500_v6, 1 }
 0x21c   :  { %v507_v10 = vmul.f32 1.442695, %v503_v7  ;;  %v509_v11 = vmul.f32 1.442695, %v504_v8  ;;  %v502_v12 = vmax.f32 %v500_v6, %v501_v9 }
 0x21e   :  { %1373 = vpow2.f32 %v507_v10  ;;  %v505_v16 = vsub.f32 %v482_v58, %v502_v12  ;;  %v506_v17 = vsub.f32 %v483_v54, %v502_v12  ;;  %v728_v10 = vpop.xlane.xlu1 %727 }
 0x21f   :  { %1375 = vpow2.f32 %v509_v11  ;;  %v722_v11 = vpop.xlane.xlu0 %721 }
 0x220   :  { %v511_v18 = vmul.f32 1.442695, %v505_v16  ;;  %v513_v19 = vmul.f32 1.442695, %v506_v17  ;;  %v760_v17 = vstv %s1958_s8  ;;  %s1528_s8 = smov 32  }
 0x222   :  { %1377 = vpow2.f32 %v511_v18 }
 0x223   :  { %1379 = vpow2.f32 %v513_v19 }
 0x228   :  { %v1374_v20 = vpop.eup %1373 }
 0x229   :  { %v1376_v21 = vpop.eup %1375  ;;  %v515_v22 = vsel %vm484_vm3, %v1374_v20, 0.0 }
 0x22a   :  { %v516_v23 = vsel %vm484_vm3, %v1376_v21, 0.0 }
 0x22b   :  { %v517_v24 = vadd.f32 %v516_v23, %v515_v22 }
 0x22c   :  { %v1378_v25 = vpop.eup %1377 }
 0x22d   :  { %v1380_v26 = vpop.eup %1379  ;;  %v518_v27 = vrot.slane %v517_v24, 4  ;;  %v524_v28 = vsel %vm484_vm3, %v1378_v25, 0.0 }
 0x22e   :  { %v525_v29 = vsel %vm484_vm3, %v1380_v26, 0.0 }
 0x22f   :  { %v519_v30 = vadd.f32 %v518_v27, %v517_v24  ;;  %v526_v31 = vadd.f32 %v525_v29, %v524_v28 }
 0x231   :  { %v520_v32 = vrot.slane %v519_v30, 2  ;;  %v527_v33 = vrot.slane %v526_v31, 4 }
 0x233   :  { %v521_v34 = vadd.f32 %v520_v32, %v519_v30  ;;  %v528_v35 = vadd.f32 %v527_v33, %v526_v31 }
 0x235   :  { %v522_v36 = vrot.slane %v521_v34, 1  ;;  %v529_v38 = vrot.slane %v528_v35, 2 }
 0x237   :  { %v523_v39 = vadd.f32 %v522_v36, %v521_v34  ;;  %v530_v40 = vadd.f32 %v529_v38, %v528_v35 }
 0x239   :  { %1381 = vrcp.f32 %v523_v39  ;;  %v531_v41 = vrot.slane %v530_v40, 1 }
 0x23b   :  { %v532_v45 = vadd.f32 %v531_v41, %v530_v40 }
 0x23d   :  { %1383 = vrcp.f32 %v532_v45 }
 0x243   :  { %v1382_v47 = vpop.eup %1381 }
 0x244   :  { %v535_v48 = vmul.f32 %v1382_v47, %v1374_v20  ;;  %v536_v49 = vmul.f32 %v1382_v47, %v1376_v21  ;;  %v1525_v47 = vmov 1983009808  }
 0x246   :  { %v539_v50 = vmul.f32 %v535_v48, %v1719_v43  ;;  %v540_v51 = vmul.f32 %v536_v49, %v1717_v42  ;;  %v719_v43 = vmul.f32 %v1709_v37, %v1672_v15  ;;  %v717_v42 = vmul.f32 %v1709_v37, %v1664_v13 }
 0x247   :  { %v1384_v52 = vpop.eup %1383  ;;  %v807_v48 = vunpack.c.l.s4 %v1525_v47  ;;  %v809_v49 = vlaneseq }
 0x248   :  { %v537_v53 = vmul.f32 %v1384_v52, %v1378_v25  ;;  %1312 = vmatprep.mubr.msk.f32.mxu0 %vm484_vm3, %v539_v50  ;;  %v538_v54 = vmul.f32 %v1384_v52, %v1380_v26  ;;  %v729_v57 = vsel %vm104_vm0, %v719_v43, 0.0  ;;  %v723_v58 = vsel %vm104_vm0, %v717_v42, 0.0 }
 0x249   :  { %1313 = vmatmul.mubr.msk.f32.vlgmr.msra.gmra.mrb[6].mxu0 %vm484_vm3, %v540_v51  ;;  %730 = vadd.xlane.f32.xlu1 %v729_v57  ;;  %v1526_v50 = vmov 1934713408   ;;  %v808_v52 = vunpack.c.0.s8 %v807_v48  ;;  %vm1915_vm9 = vcmp.lt.s32.totalorder %v809_v49, 512 }
 0x24a   :  { %v541_v55 = vmul.f32 %v537_v53, %v1725_v46  ;;  %v542_v56 = vmul.f32 %v538_v54, %v1723_v44  ;;  %724 = vadd.xlane.f32.xlu0 %v723_v58  ;;  %v1229_v44 = vld [vmem:[%s1957_s7] ss:$0 sm:$0xff]  ;;  %v822_v51 = vunpack.c.l.s4 %v1526_v50  ;;  %v1782_v53 = vshrl.u32 %v809_v49, 7 }
 0x24c   :  { %1319 = vmatprep.mubr.msk.f32.mxu1 %vm484_vm3, %v541_v55  ;;  %v823_v43 = vunpack.c.0.s8 %v822_v51 }
 0x24d   :  { %1320 = vmatmul.mubr.msk.f32.vlgmr.msra.gmra.mrb[6].mxu1 %vm484_vm3, %v542_v56 }
 0x2d6   :  { %v731_v12 = vpop.xlane.xlu1 %730 }
 0x2d7   :  { %v725_v16 = vpop.xlane.xlu0 %724 }
 0x31c   :  { %v1751_v59 = vpop.f32.mrb[6].mxu0 }
 0x31d   :  { %v706_v46 = vmax.f32 %v1751_v59, 0.0  ;;  %v1757_v60 = vpop.f32.mrb[7].mxu0 }
 0x31e   :  { %v705_v61 = vmax.f32 %v1757_v60, 0.0 }
 0x31f   :  { %v740_v37 = vmul.f32 %v1229_v44, %v706_v46 }
 0x320   :  { %v739_v62 = vmul.f32 %v1229_v44, %v705_v61  ;;  %v1764_v63 = vpop.f32.mrb[6].mxu1 }
 0x321   :  { %v708_v0 = vmax.f32 %v1764_v63, 0.0  ;;  %v1767_v1 = vpop.f32.mrb[7].mxu1  ;;  %v746_v2 = vsel %vm104_vm0, %v740_v37, 0.0 }
 0x322   :  { %v707_v3 = vmax.f32 %v1767_v1, 0.0  ;;  %747 = vadd.xlane.f32.xlu1 %v746_v2  ;;  %v743_v4 = vsel %vm104_vm0, %v739_v62, 0.0 }
 0x323   :  { %744 = vadd.xlane.f32.xlu0 %v743_v4  ;;  %v742_v6 = vmul.f32 %v1229_v44, %v708_v0 }
 0x324   :  { %v741_v7 = vmul.f32 %v1229_v44, %v707_v3  ;;  %v1788_v44 = vsub.s32 %v808_v52, %v1782_v53 }
 0x325   :  { %v752_v8 = vsel %vm104_vm0, %v742_v6, 0.0 }
 0x326   :  { %753 = vadd.xlane.f32.xlu1 %v752_v8  ;;  %v749_v9 = vsel %vm104_vm0, %v741_v7, 0.0  ;;  %v1794_v7 = vsub.s32 %v823_v43, %v1782_v53 }
 0x327   :  { %750 = vadd.xlane.f32.xlu0 %v749_v9 }
 0x3af   :  { %v748_v18 = vpop.xlane.xlu1 %747 }
 0x3b0   :  { %v756_v19 = vadd.f32 %v748_v18, %v725_v16  ;;  %v745_v20 = vpop.xlane.xlu0 %744 }
 0x3b1   :  { %v755_v21 = vadd.f32 %v745_v20, %v722_v11  ;;  %v1527_v11 = vmov 0.0  }
 0x3b2   :  { %v762_v22 = vadd.f32 %v760_v17, %v756_v19 }
 0x3b3   :  { %v761_v23 = vadd.f32 %v760_v17, %v755_v21  ;;  %v754_v24 = vpop.xlane.xlu1 %753 }
 0x3b4   :  { %v1231_v25 = vmul.f32 -1.442695, %v762_v22  ;;  %v758_v26 = vadd.f32 %v754_v24, %v731_v12  ;;  %v751_v27 = vpop.xlane.xlu0 %750 }
 0x3b5   :  { %v1230_v28 = vmul.f32 -1.442695, %v761_v23  ;;  %v757_v29 = vadd.f32 %v751_v27, %v728_v10 }
 0x3b6   :  { %1385 = vpow2.f32 %v1231_v25  ;;  %v764_v30 = vadd.f32 %v760_v17, %v758_v26 }
 0x3b7   :  { %1387 = vpow2.f32 %v1230_v28  ;;  %v763_v31 = vadd.f32 %v760_v17, %v757_v29 }
 0x3b8   :  { %v1233_v32 = vmul.f32 -1.442695, %v764_v30 }
 0x3b9   :  { %v1232_v33 = vmul.f32 -1.442695, %v763_v31 }
 0x3ba   :  { %1389 = vpow2.f32 %v1233_v32 }
 0x3bb   :  { %1391 = vpow2.f32 %v1232_v33 }
 0x3c0   :  { %v1386_v34 = vpop.eup %1385 }
 0x3c1   :  { %v1388_v35 = vpop.eup %1387  ;;  %v778_v36 = vadd.f32 1.0, %v1386_v34 }
 0x3c2   :  { %v777_v38 = vadd.f32 1.0, %v1388_v35 }
 0x3c3   :  { %1393 = vrcp.f32 %v778_v36 }
 0x3c4   :  { %v1390_v39 = vpop.eup %1389  ;;  %1395 = vrcp.f32 %v777_v38 }
 0x3c5   :  { %v1392_v40 = vpop.eup %1391  ;;  %v780_v41 = vadd.f32 1.0, %v1390_v39 }
 0x3c6   :  { %v779_v45 = vadd.f32 1.0, %v1392_v40 }
 0x3c7   :  { %1397 = vrcp.f32 %v780_v41 }
 0x3c8   :  { %1399 = vrcp.f32 %v779_v45 }
 0x3cd   :  { %v1394_v54 = vpop.eup %1393 }
 0x3ce   :  { %v1396_v55 = vpop.eup %1395  ;;  %v794_v56 = vsub.f32 1.0, %v1394_v54  ;;  %v790_v57 = vmul.f32 %v1394_v54, %v1664_v13 }
 0x3cf   :  { %v793_v42 = vsub.f32 1.0, %v1396_v55  ;;  %v789_v62 = vmul.f32 %v1396_v55, %v1658_v5 }
 0x3d0   :  { %v798_v58 = vmul.f32 %v794_v56, %v706_v46 }
 0x3d1   :  { %v1398_v37 = vpop.eup %1397  ;;  %v797_v2 = vmul.f32 %v793_v42, %v705_v61 }
 0x3d2   :  { %v1400_v4 = vpop.eup %1399  ;;  %v802_v6 = vadd.f32 %v798_v58, %v790_v57  ;;  %v796_v8 = vsub.f32 1.0, %v1398_v37  ;;  %v792_v46 = vmul.f32 %v1398_v37, %v1672_v15 }
 0x3d3   :  { %v801_v9 = vadd.f32 %v797_v2, %v789_v62  ;;  %v795_v13 = vsub.f32 1.0, %v1400_v4  ;;  %v791_v19 = vmul.f32 %v1400_v4, %v1666_v14 }
 0x3d4   :  { %v861_v59 = vrot.slane %v802_v6, %v1788_v44  ;;  %v800_v10 = vmul.f32 %v796_v8, %v708_v0  ;;  %v854_v23 = vcombine.high %v802_v6, %v1527_v11 }
 0x3d5   :  { %v805_v5 = vcombine.high %v801_v9, %v1527_v11  ;;  %v799_v16 = vmul.f32 %v795_v13, %v707_v3  ;;  %v812_v0 = vrot.slane %v801_v9, %v1788_v44 }
 0x3d6   :  { %v1802_v60 = vrot.slane %v861_v59, %v1794_v7  ;;  %v804_v61 = vadd.f32 %v800_v10, %v792_v46  ;;  %v869_v15 = vcombine.high %v861_v59, %v1527_v11  ;;  %v868_v28 = vrot.slane %v854_v23, %v1788_v44 }
 0x3d7   :  { %v819_v12 = vrot.slane %v805_v5, %v1788_v44  ;;  %v803_v20 = vadd.f32 %v799_v16, %v791_v19  ;;  %v1824_v22 = vrot.slane %v812_v0, %v1794_v7  ;;  %v820_v27 = vcombine.high %v812_v0, %v1527_v11 }
 0x3d8   :  { %v899_v17 = vcombine.high %v1802_v60, %v1527_v11  ;;  %v959_v63 = vrot.slane %v804_v61, %v1788_v44  ;;  %v883_v21 = vrot.slane %v869_v15, %v1794_v7  ;;  %v952_v31 = vcombine.high %v804_v61, %v1527_v11 }
 0x3d9   :  { %v1813_v18 = vrot.slane %v819_v12, %v1794_v7  ;;  %v910_v25 = vrot.slane %v803_v20, %v1788_v44  ;;  %v850_v26 = vcombine.high %v1824_v22, %v1527_v11  ;;  %v834_v32 = vrot.slane %v820_v27, %v1794_v7 }
 0x3da   :  { %1051 = vrot.lane.b32.xlu0 %v899_v17, %s1528_s8  ;;  %v1820_v3 = vrot.slane %v959_v63, %v1794_v7  ;;  %v967_v24 = vcombine.high %v959_v63, %v1527_v11  ;;  %v1846_v33 = vrot.slane %v868_v28, %v1794_v7  ;;  %v966_v36 = vrot.slane %v952_v31, %v1788_v44 }
 0x3db   :  { %v852_v1 = vcombine.high %v1813_v18, %v1527_v11  ;;  %v1841_v30 = vrot.slane %v910_v25, %v1794_v7  ;;  %v918_v35 = vcombine.high %v910_v25, %v1527_v11  ;;  %v884_v39 = vcombine.high %v868_v28, %v1527_v11 }
 0x3dc   :  { %v997_v14 = vcombine.high %v1820_v3, %v1527_v11  ;;  %v981_v29 = vrot.slane %v967_v24, %v1794_v7  ;;  %v901_v38 = vcombine.high %v1846_v33, %v1527_v11  ;;  %v1861_v41 = vrot.slane %v966_v36, %v1794_v7 }
 0x3dd   :  { %1027 = vrot.lane.b32.xlu1 %v852_v1, %s1528_s8  ;;  %v948_v34 = vcombine.high %v1841_v30, %v1527_v11  ;;  %v932_v40 = vrot.slane %v918_v35, %v1794_v7  ;;  %v898_v45 = vrot.slane %v884_v39, %v1794_v7  ;;  %v982_v48 = vcombine.high %v966_v36, %v1527_v11 }
 0x3de   :  { %1059 = vrot.lane.b32.xlu0 %v883_v21, %s1529_s19  ;;  %v999_v47 = vcombine.high %v1861_v41, %v1527_v11  ;;  %v903_v50 = vcombine.high %v803_v20, %v1527_v11  ;;  %v900_v51 = vcombine.high %v883_v21, %v1527_v11  ;;  %v835_v52 = vcombine.high %v819_v12, %v1527_v11 }
 0x3df   :  { %v996_v54 = vrot.slane %v982_v48, %v1794_v7  ;;  %v998_v43 = vcombine.high %v981_v29, %v1527_v11  ;;  %v851_v57 = vcombine.high %v834_v32, %v1527_v11  ;;  %v902_v2 = vcombine.high %v898_v45, %v1527_v11 }
 0x3e0   :  { %v917_v55 = vrot.slane %v903_v50, %v1788_v44  ;;  %v849_v56 = vrot.slane %v835_v52, %v1794_v7  ;;  %v949_v4 = vcombine.high %v932_v40, %v1527_v11  ;;  %v1531_v21 = vmov 1966171168  }
 0x3e1   :  { %1053 = vrot.lane.b32.xlu1 %v997_v14, %s1528_s8  ;;  %v1000_v8 = vcombine.high %v996_v54, %v1527_v11 }
 0x3e2   :  { %1003 = vrot.lane.b32.xlu0 %v850_v26, %s1528_s8  ;;  %v1880_v42 = vrot.slane %v917_v55, %v1794_v7  ;;  %v933_v44 = vcombine.high %v917_v55, %v1527_v11  ;;  %v853_v37 = vcombine.high %v849_v56, %v1527_v11 }
 0x3e4   :  { %v950_v58 = vcombine.high %v1880_v42, %v1527_v11  ;;  %v947_v62 = vrot.slane %v933_v44, %v1794_v7 }
 0x3e5   :  { %1061 = vrot.lane.b32.xlu1 %v981_v29, %s1529_s19 }
 0x3e6   :  { %1011 = vrot.lane.b32.xlu0 %v834_v32, %s1529_s19  ;;  %v951_v6 = vcombine.high %v947_v62, %v1527_v11  ;;  %v1134_v11 = vunpack.c.l.s4 %v1531_v21 }
 0x3e8   :  { %v1135_v25 = vunpack.c.0.s8 %v1134_v11 }
 0x3e9   :  { %1005 = vrot.lane.b32.xlu1 %v948_v34, %s1528_s8 }
 0x3ea   :  { %1075 = vrot.lane.b32.xlu0 %v901_v38, %s1528_s8  ;;  %v1138_v38 = vsub.s32 %v1135_v25, %v1782_v53 }
 0x3ed   :  { %1013 = vrot.lane.b32.xlu1 %v932_v40, %s1529_s19 }
 0x3ee   :  { %1083 = vrot.lane.b32.xlu0 %v898_v45, %s1529_s19 }
 0x3f1   :  { %1077 = vrot.lane.b32.xlu1 %v999_v47, %s1528_s8 }
 0x3f2   :  { %1067 = vrot.lane.b32.xlu0 %v900_v51, %s1530_s20 }
 0x3f5   :  { %1085 = vrot.lane.b32.xlu1 %v996_v54, %s1529_s19 }
 0x3f6   :  { %1035 = vrot.lane.b32.xlu0 %v849_v56, %s1529_s19 }
 0x3f9   :  { %1069 = vrot.lane.b32.xlu1 %v998_v43, %s1530_s20 }
 0x3fa   :  { %1019 = vrot.lane.b32.xlu0 %v851_v57, %s1530_s20 }
 0x3fd   :  { %1029 = vrot.lane.b32.xlu1 %v950_v58, %s1528_s8 }
 0x3fe   :  { %1043 = vrot.lane.b32.xlu0 %v853_v37, %s1530_s20 }
 0x401   :  { %1037 = vrot.lane.b32.xlu1 %v947_v62, %s1529_s19 }
 0x402   :  { %1091 = vrot.lane.b32.xlu0 %v902_v2, %s1530_s20 }
 0x405   :  { %1021 = vrot.lane.b32.xlu1 %v949_v4, %s1530_s20 }
 0x409   :  { %1045 = vrot.lane.b32.xlu1 %v951_v6, %s1530_s20 }
 0x40d   :  { %1093 = vrot.lane.b32.xlu1 %v1000_v8, %s1530_s20 }
 0x44c   :  { %v1052_v9 = vpop.permute.xlu0 %1051 }
 0x44d   :  { %v1111_v31 = vsel %vm104_vm0, %v1802_v60, %v1052_v9 }
 0x44f   :  { %v1028_v13 = vpop.permute.xlu1 %1027 }
 0x450   :  { %v1060_v59 = vpop.permute.xlu0 %1059  ;;  %v1105_v23 = vsel %vm104_vm0, %v1813_v18, %v1028_v13 }
 0x451   :  { %v1113_v35 = vsel %vm1099_vm7, %v1111_v31, %v1060_v59 }
 0x453   :  { %v1054_v46 = vpop.permute.xlu1 %1053 }
 0x454   :  { %v1004_v10 = vpop.permute.xlu0 %1003 }
 0x455   :  { %v1097_v27 = vsel %vm104_vm0, %v1824_v22, %v1004_v10 }
 0x457   :  { %v1062_v7 = vpop.permute.xlu1 %1061 }
 0x458   :  { %v1012_v5 = vpop.permute.xlu0 %1011 }
 0x459   :  { %v1100_v29 = vsel %vm1099_vm7, %v1097_v27, %v1012_v5 }
 0x45b   :  { %v1006_v61 = vpop.permute.xlu1 %1005 }
 0x45c   :  { %v1076_v12 = vpop.permute.xlu0 %1075  ;;  %v1098_v55 = vsel %vm104_vm0, %v1841_v30, %v1006_v61 }
 0x45d   :  { %v1117_v18 = vsel %vm104_vm0, %v1846_v33, %v1076_v12 }
 0x45f   :  { %v1014_v16 = vpop.permute.xlu1 %1013 }
 0x460   :  { %v1084_v17 = vpop.permute.xlu0 %1083  ;;  %v1101_v57 = vsel %vm1099_vm7, %v1098_v55, %v1014_v16 }
 0x461   :  { %v1119_v36 = vsel %vm1099_vm7, %v1117_v18, %v1084_v17 }
 0x463   :  { %v1078_v15 = vpop.permute.xlu1 %1077 }
 0x464   :  { %v1068_v63 = vpop.permute.xlu0 %1067  ;;  %v1118_v58 = vsel %vm104_vm0, %v1861_v41, %v1078_v15 }
 0x465   :  { %v1115_v40 = vsel %vm1102_vm8, %v1113_v35, %v1068_v63 }
 0x467   :  { %v1086_v0 = vpop.permute.xlu1 %1085 }
 0x468   :  { %v1036_v19 = vpop.permute.xlu0 %1035  ;;  %v1120_v30 = vsel %vm1099_vm7, %v1118_v58, %v1086_v0 }
 0x469   :  { %v1107_v24 = vsel %vm1099_vm7, %v1105_v23, %v1036_v19 }
 0x46b   :  { %v1070_v1 = vpop.permute.xlu1 %1069 }
 0x46c   :  { %v1020_v20 = vpop.permute.xlu0 %1019 }
 0x46d   :  { %v1103_v32 = vsel %vm1102_vm8, %v1100_v29, %v1020_v20 }
 0x46f   :  { %v1030_v14 = vpop.permute.xlu1 %1029 }
 0x470   :  { %v1044_v26 = vpop.permute.xlu0 %1043  ;;  %v1106_v33 = vsel %vm104_vm0, %v1880_v42, %v1030_v14  ;;  %v1112_v42 = vsel %vm104_vm0, %v1820_v3, %v1054_v46 }
 0x471   :  { %v1109_v28 = vsel %vm1102_vm8, %v1107_v24, %v1044_v26  ;;  %v1114_v49 = vsel %vm1099_vm7, %v1112_v42, %v1062_v7 }
 0x472   :  { %v1131_v22 = vcombine.low %v1103_v32, %v1109_v28  ;;  %v1116_v2 = vsel %vm1102_vm8, %v1114_v49, %v1070_v1 }
 0x473   :  { %v1038_v34 = vpop.permute.xlu1 %1037 }
 0x474   :  { %v1092_v39 = vpop.permute.xlu0 %1091  ;;  %v1139_v48 = vrot.slane %v1131_v22, %v1138_v38  ;;  %v1108_v52 = vsel %vm1099_vm7, %v1106_v33, %v1038_v34 }
 0x475   :  { %v1121_v45 = vsel %vm1102_vm8, %v1119_v36, %v1092_v39 }
 0x476   :  { %v1132_v47 = vcombine.low %v1115_v40, %v1121_v45 }
 0x477   :  { %v1022_v60 = vpop.permute.xlu1 %1021 }
 0x478   :  { %v1146_v50 = vrot.slane %v1132_v47, %v1138_v38  ;;  %v1104_v44 = vsel %vm1102_vm8, %v1101_v57, %v1022_v60 }
 0x47a   :  { %v1147_v51 = vcombine.low %v1139_v48, %v1146_v50 }
 0x47b   :  { %v1046_v54 = vpop.permute.xlu1 %1045 }
 0x47c   :  { %v1154_v56 = vrot.slane %v1147_v51, %v1138_v38  ;;  %v1110_v43 = vsel %vm1102_vm8, %v1108_v52, %v1046_v54 }
 0x47d   :  { %v1155_v37 = vcombine.low %v1104_v44, %v1110_v43 }
 0x47e   :  { %1185 = vst.msk [vmem:[#allocation11] sm:$0xf] %vm1915_vm9, %v1154_v56 }
 0x47f   :  { %v1094_v62 = vpop.permute.xlu1 %1093  ;;  %v1163_v3 = vrot.slane %v1155_v37, %v1138_v38 }
 0x480   :  { %v1122_v4 = vsel %vm1102_vm8, %v1120_v30, %v1094_v62 }
 0x481   :  { %v1156_v6 = vcombine.low %v1116_v2, %v1122_v4 }
 0x483   :  { %v1170_v8 = vrot.slane %v1156_v6, %v1138_v38 }
 0x485   :  { %v1171_v41 = vcombine.low %v1163_v3, %v1170_v8 }
 0x487   :  { %v1178_v9 = vrot.slane %v1171_v41, %v1138_v38 }
 0x489   :  { %1186 = vst.msk [vmem:[#allocation11 + $0x4] sm:$0xf] %vm1915_vm9, %v1178_v9 }
 0x48a   :  { %1500 = shalt.err (!%p1497_p8)
}
 0x48b   :  { %s1501_s12 = scalar_lea.hbm %s1959_s9, 128 }
 0x48c   :  { %p1502_p9 = scmp.ne.s32.totalorder %s1959_s9, %s1501_s12  ;;  %p1505_p10 = scmp.lt.u32.totalorder %s1501_s12, %s1959_s9 }
 0x48e   :  { %p1507_p11 = pnand %p1505_p10, %p1502_p9 }
 0x490   :  { %1510 = shalt.err (!%p1507_p11)
}
 0x491   :  { %s1533_s11 = smov 4  }
 0x492   :  { %1198 = dma.vmem_to_hbm [thread:$0]  %s1193_s24, 128, %s1959_s9, [#allocation5], %s1529_s19, %s1529_s19, %s1533_s11  }
 0x493   :  { %1517 = dma.done.wait [#allocation5], 128  }
 0x494   :  { %1518 = vsyncadd [#allocation5], 4294967168 }
 0x495   :  { %1202 = vsyncpa [#allocation4], 1 }
 0x496   :  { %1203 = vsyncpa [#allocation7], 1 }
 0x497   :  { %1204 = vsyncpa [#allocation10], 1 }
 0x498   :  { %1205 = vsyncpa [#allocation5], 1 }

</bundles_post_ra>
